<compile_context>
chip_gen: v7x
topology: tpu7x:2x2x1
jax: 0.10.0
libtpu: 0.0.40
codegen_flags: <defaults>
</compile_context>

<pallas_src>
import functools
import math

import jax
import jax.numpy as jnp
import numpy as np
from jax.experimental import pallas as pl
from jax.experimental.pallas import tpu as pltpu


# ---------------------------------------------------------------------------
# Host-side (compile-time) construction of the separable Gaussian operators.
# ---------------------------------------------------------------------------
def _gaussian_window_1d(window_size: int = 11, sigma: float = 1.5) -> np.ndarray:
    """Same construction as GaussianFilter2D._get_gaussian_window1d."""
    assert window_size % 2 == 1, "Window size must be odd."
    half = window_size // 2
    xs = np.arange(-half, half + 1, dtype=np.float64)
    w = np.exp(-0.5 * xs * xs / (sigma * sigma))
    w = w / w.sum()
    return w.astype(np.float32)


def _band_matrix(n: int, g1d: np.ndarray) -> np.ndarray:
    """(n, n) symmetric operator B with (x @ B) == 1-D zero-padded 'same' conv."""
    ws = g1d.shape[0]
    pad = ws // 2
    b = np.zeros((n, n), dtype=np.float32)
    for i in range(n):                                           # output index
        for k in range(max(0, i - pad), min(n, i + pad + 1)):    # input index
            b[k, i] = g1d[i - k + pad]
    return b


# ---------------------------------------------------------------------------
# Pallas kernel: one block of P planes per grid step.  Everything is 2-D.
# ---------------------------------------------------------------------------
def _ssim_kernel(x_ref, y_ref, bw_ref, bh_ref, o_ref, *, C1, C2, planes, H, W):
    P = planes
    x = x_ref[...]            # (P*H, W), rows ordered (plane, h)
    y = y_ref[...]
    bw = bw_ref[...]          # (W, W) band operator: blur along W (zero pad)
    bh = bh_ref[...]          # (H, H) band operator: blur along H (zero pad)

    # Hoisted products, computed exactly once per plane block.
    x2 = x * x
    y2 = y * y
    xy = x * y

    dot = functools.partial(jnp.dot, preferred_element_type=jnp.float32)

    # Pass 1 (blur along W): all five moments fused into ONE matmul with
    # 5*P*H moving rows on the MXU.
    s = jnp.concatenate([x, y, x2, y2, xy], axis=0)          # (5*P*H, W)
    t = dot(s, bw)                                           # (5*P*H, W)

    # Regroup the (moment, plane) row blocks into column blocks so pass 2
    # (blur along H, contraction from the left with the symmetric band_H)
    # is also a single matmul.  Static slices + lane concat only.
    tc = jnp.concatenate(
        [t[j * H:(j + 1) * H, :] for j in range(5 * P)], axis=1)   # (H, 5*P*W)
    u = dot(bh, tc)                                                # (H, 5*P*W)

    PW = P * W
    mu_x = u[:, 0 * PW:1 * PW]
    mu_y = u[:, 1 * PW:2 * PW]
    e_x2 = u[:, 2 * PW:3 * PW]
    e_y2 = u[:, 3 * PW:4 * PW]
    e_xy = u[:, 4 * PW:5 * PW]

    mu_x2 = mu_x * mu_x
    mu_y2 = mu_y * mu_y
    mu_xy = mu_x * mu_y

    a1 = 2.0 * mu_xy + C1
    a2 = 2.0 * (e_xy - mu_xy) + C2
    b1 = mu_x2 + mu_y2 + C1
    b2 = (e_x2 - mu_x2) + (e_y2 - mu_y2) + C2

    # EUP reciprocal (otherwise-idle slot) instead of a VALU divide.
    ssim = (a1 * a2) * pl.reciprocal(b1 * b2, approx=True)    # (H, P*W), cols (plane, w)

    # Back to the input row layout (P*H, W), rows (plane, h), so the global
    # SSIM map reshapes to (B, C, H, W) for free on the host.
    o_ref[...] = jnp.concatenate(
        [ssim[:, p * W:(p + 1) * W] for p in range(P)], axis=0)


# ---------------------------------------------------------------------------
# Tiling heuristic.
# ---------------------------------------------------------------------------
def _choose_planes(nc: int, h: int) -> int:
    """Planes per grid step.

    The input block is (P*H, W); its sublane dim P*H must be a multiple of 8
    (or the full extent).  P=1 whenever H % 8 == 0 — the MXU rows are already
    filled by the 5*H stacked-moment rows, and a small P keeps the grid long
    enough to shard across both v7x TensorCores."""
    base = 8 // math.gcd(h, 8)
    if nc % base == 0:
        return base
    # Fallback: one step over the full extent (always layout-legal).
    # TODO(synk): smarter row tiling for large N*C with H not a multiple of 8.
    return nc


# ---------------------------------------------------------------------------
# Wrapper: matches SSIM(window_size=11, in_channels=C, sigma=1.5).forward(x, y)
# ---------------------------------------------------------------------------
def ssim_pallas(x, y, *, window_size=11, sigma=1.5, K1=0.01, K2=0.03, L=1.0,
                keep_batch_dim=False, return_log=False):
    assert x.shape == y.shape and x.ndim == 4
    B, C, H, W = x.shape
    NC = B * C

    C1 = (K1 * L) ** 2
    C2 = (K2 * L) ** 2

    g = _gaussian_window_1d(window_size, sigma)
    bw = jnp.asarray(_band_matrix(W, g))   # (W, W)
    bh = jnp.asarray(_band_matrix(H, g))   # (H, H)

    P = _choose_planes(NC, H)
    # ~15 live f32 temporaries of (P*H, W) in-kernel plus pipelined blocks.
    assert P * H * W <= 320 * 1024, (
        "ssim_pallas: plane block too large for the 32 MiB VMEM budget")
    # TODO(synk): tile the W axis of the second matmul for planes > ~512x512.

    # Free, metadata-only reshapes — no pre-padding, no extra HBM copies.
    xf = x.reshape(NC * H, W).astype(jnp.float32)
    yf = y.reshape(NC * H, W).astype(jnp.float32)

    grid = (NC // P,)
    kernel = functools.partial(_ssim_kernel, C1=C1, C2=C2, planes=P, H=H, W=W)

    flops = 2 * 5 * NC * H * W * (H + W) + 40 * NC * H * W
    bytes_accessed = 4 * (3 * NC * H * W + H * H + W * W)

    ssim_map = pl.pallas_call(
        kernel,
        out_shape=jax.ShapeDtypeStruct((NC * H, W), jnp.float32),
        grid=grid,
        in_specs=[
            pl.BlockSpec((P * H, W), lambda n: (n, 0)),   # x plane block
            pl.BlockSpec((P * H, W), lambda n: (n, 0)),   # y plane block
            pl.BlockSpec((W, W), lambda n: (0, 0)),       # band_W (VMEM resident)
            pl.BlockSpec((H, H), lambda n: (0, 0)),       # band_H (VMEM resident)
        ],
        out_specs=pl.BlockSpec((P * H, W), lambda n: (n, 0)),
        compiler_params=pltpu.CompilerParams(
            dimension_semantics=("parallel",),
            vmem_limit_bytes=32 * 1024 * 1024,   # safe on v5e/v6e (128 MiB) and v7x (64 MiB)
        ),
        cost_estimate=pl.CostEstimate(
            flops=flops, transcendentals=NC * H * W, bytes_accessed=bytes_accessed),
    )(xf, yf, bw, bh)

    ssim_map = ssim_map.reshape(B, C, H, W)   # free reshape

    if return_log:
        ssim_map = ssim_map - ssim_map.min()
        ssim_map = ssim_map / ssim_map.max()
        ssim_map = -jnp.log(ssim_map + 1e-08)

    if keep_batch_dim:
        return ssim_map.mean(axis=(1, 2, 3))
    return ssim_map.mean()


# ---------------------------------------------------------------------------
# Pure-JAX reference (depthwise lax conv), mirrors the PyTorch module.
# ---------------------------------------------------------------------------
def _ssim_reference(x, y, *, window_size=11, sigma=1.5, K1=0.01, K2=0.03, L=1.0):
    B, C, H, W = x.shape
    pad = window_size // 2
    g = jnp.asarray(_gaussian_window_1d(window_size, sigma))
    w2d = jnp.outer(g, g)
    wgt = jnp.tile(w2d[None, None], (C, 1, 1, 1))  # (C, 1, ws, ws)
    C1 = (K1 * L) ** 2
    C2 = (K2 * L) ** 2

    def gf(t):
        return jax.lax.conv_general_dilated(
            t.astype(jnp.float32), wgt, window_strides=(1, 1),
            padding=((pad, pad), (pad, pad)),
            dimension_numbers=("NCHW", "OIHW", "NCHW"),
            feature_group_count=C,
            precision=jax.lax.Precision.HIGHEST)

    mu_x = gf(x)
    mu_y = gf(y)
    sigma2_x = gf(x * x) - mu_x * mu_x
    sigma2_y = gf(y * y) - mu_y * mu_y
    sigma_xy = gf(x * y) - mu_x * mu_y
    A1 = 2 * mu_x * mu_y + C1
    A2 = 2 * sigma_xy + C2
    B1 = mu_x * mu_x + mu_y * mu_y + C1
    B2 = sigma2_x + sigma2_y + C2
    return ((A1 / B1) * (A2 / B2)).mean()


if __name__ == "__main__":
    key = jax.random.PRNGKey(0)
    kx, ky = jax.random.split(key)
    B, C, H, W = 2, 4, 16, 16
    x = jax.random.uniform(kx, (B, C, H, W), dtype=jnp.float32)
    y = jax.random.uniform(ky, (B, C, H, W), dtype=jnp.float32)

    out = jax.block_until_ready(ssim_pallas(x, y))
    ref = jax.block_until_ready(_ssim_reference(x, y))

    assert np.allclose(np.asarray(out), np.asarray(ref), rtol=2e-3, atol=2e-3), (
        f"pallas={out}, ref={ref}")
    print("KERNEL_OK")
</pallas_src>

<mosaic_0001>
module attributes {stable_mosaic.version = 11 : i64} {
  func.func @_ssim_kernel(%arg0: i32, %arg1: memref<16x16xf32, #tpu.memory_space<vmem>>, %arg2: memref<16x16xf32, #tpu.memory_space<vmem>>, %arg3: memref<16x16xf32, #tpu.memory_space<vmem>>, %arg4: memref<16x16xf32, #tpu.memory_space<vmem>>, %arg5: memref<16x16xf32, #tpu.memory_space<vmem>>) attributes {dimension_semantics = [#tpu.dimension_semantics<parallel>], iteration_bounds = array<i64: 8>, scalar_prefetch = 0 : i64, scratch_operands = 0 : i64, tpu.core_type = #tpu.core_type<tc>, window_params = [{transform_indices = @transform_0, window_bounds = array<i64: 16, 16>}, {transform_indices = @transform_1, window_bounds = array<i64: 16, 16>}, {pipeline_mode = #tpu.pipeline_mode<synchronous>, transform_indices = @transform_2, window_bounds = array<i64: 16, 16>}, {pipeline_mode = #tpu.pipeline_mode<synchronous>, transform_indices = @transform_3, window_bounds = array<i64: 16, 16>}, {transform_indices = @transform_4, window_bounds = array<i64: 16, 16>}]} {
    %c0 = arith.constant 0 : index
    %c0_0 = arith.constant 0 : index
    %0 = vector.load %arg1[%c0, %c0_0] : memref<16x16xf32, #tpu.memory_space<vmem>>, vector<16x16xf32>
    %c0_1 = arith.constant 0 : index
    %c0_2 = arith.constant 0 : index
    %1 = vector.load %arg2[%c0_1, %c0_2] : memref<16x16xf32, #tpu.memory_space<vmem>>, vector<16x16xf32>
    %c0_3 = arith.constant 0 : index
    %c0_4 = arith.constant 0 : index
    %2 = vector.load %arg3[%c0_3, %c0_4] : memref<16x16xf32, #tpu.memory_space<vmem>>, vector<16x16xf32>
    %c0_5 = arith.constant 0 : index
    %c0_6 = arith.constant 0 : index
    %3 = vector.load %arg4[%c0_5, %c0_6] : memref<16x16xf32, #tpu.memory_space<vmem>>, vector<16x16xf32>
    %4 = arith.mulf %0, %0 : vector<16x16xf32>
    %5 = arith.mulf %1, %1 : vector<16x16xf32>
    %6 = arith.mulf %0, %1 : vector<16x16xf32>
    %7 = tpu.concatenate %0, %1, %4, %5, %6 in 0 : vector<16x16xf32>, vector<16x16xf32>, vector<16x16xf32>, vector<16x16xf32>, vector<16x16xf32> -> vector<80x16xf32>
    %cst = arith.constant dense<0.000000e+00> : vector<80x16xf32>
    %8 = tpu.matmul %7, %2, %cst {dimension_numbers = #tpu.dot_dimension_numbers<[1], [0], [0], [1], [0, 0, 1, 1], [], []>} : vector<80x16xf32>, vector<16x16xf32>, vector<80x16xf32> -> vector<80x16xf32>
    %9 = vector.extract_strided_slice %8 {offsets = [0, 0], sizes = [16, 16], strides = [1, 1]} : vector<80x16xf32> to vector<16x16xf32>
    %10 = vector.extract_strided_slice %8 {offsets = [16, 0], sizes = [16, 16], strides = [1, 1]} : vector<80x16xf32> to vector<16x16xf32>
    %11 = vector.extract_strided_slice %8 {offsets = [32, 0], sizes = [16, 16], strides = [1, 1]} : vector<80x16xf32> to vector<16x16xf32>
    %12 = vector.extract_strided_slice %8 {offsets = [48, 0], sizes = [16, 16], strides = [1, 1]} : vector<80x16xf32> to vector<16x16xf32>
    %13 = vector.extract_strided_slice %8 {offsets = [64, 0], sizes = [16, 16], strides = [1, 1]} : vector<80x16xf32> to vector<16x16xf32>
    %14 = tpu.concatenate %9, %10, %11, %12, %13 in 1 : vector<16x16xf32>, vector<16x16xf32>, vector<16x16xf32>, vector<16x16xf32>, vector<16x16xf32> -> vector<16x80xf32>
    %cst_7 = arith.constant dense<0.000000e+00> : vector<16x80xf32>
    %15 = tpu.matmul %3, %14, %cst_7 {dimension_numbers = #tpu.dot_dimension_numbers<[1], [0], [0], [1], [0, 0, 1, 1], [], []>} : vector<16x16xf32>, vector<16x80xf32>, vector<16x80xf32> -> vector<16x80xf32>
    %16 = vector.extract_strided_slice %15 {offsets = [0, 0], sizes = [16, 16], strides = [1, 1]} : vector<16x80xf32> to vector<16x16xf32>
    %17 = vector.extract_strided_slice %15 {offsets = [0, 16], sizes = [16, 16], strides = [1, 1]} : vector<16x80xf32> to vector<16x16xf32>
    %18 = vector.extract_strided_slice %15 {offsets = [0, 32], sizes = [16, 16], strides = [1, 1]} : vector<16x80xf32> to vector<16x16xf32>
    %19 = vector.extract_strided_slice %15 {offsets = [0, 48], sizes = [16, 16], strides = [1, 1]} : vector<16x80xf32> to vector<16x16xf32>
    %20 = vector.extract_strided_slice %15 {offsets = [0, 64], sizes = [16, 16], strides = [1, 1]} : vector<16x80xf32> to vector<16x16xf32>
    %21 = arith.mulf %16, %16 : vector<16x16xf32>
    %22 = arith.mulf %17, %17 : vector<16x16xf32>
    %23 = arith.mulf %16, %17 : vector<16x16xf32>
    %cst_8 = arith.constant 2.000000e+00 : f32
    %24 = vector.broadcast %cst_8 : f32 to vector<16x16xf32>
    %25 = arith.mulf %24, %23 : vector<16x16xf32>
    %cst_9 = arith.constant 9.99999974E-5 : f32
    %26 = vector.broadcast %cst_9 : f32 to vector<16x16xf32>
    %27 = arith.addf %25, %26 : vector<16x16xf32>
    %28 = arith.subf %20, %23 : vector<16x16xf32>
    %cst_10 = arith.constant 2.000000e+00 : f32
    %29 = vector.broadcast %cst_10 : f32 to vector<16x16xf32>
    %30 = arith.mulf %29, %28 : vector<16x16xf32>
    %cst_11 = arith.constant 8.99999984E-4 : f32
    %31 = vector.broadcast %cst_11 : f32 to vector<16x16xf32>
    %32 = arith.addf %30, %31 : vector<16x16xf32>
    %33 = arith.addf %21, %22 : vector<16x16xf32>
    %cst_12 = arith.constant 9.99999974E-5 : f32
    %34 = vector.broadcast %cst_12 : f32 to vector<16x16xf32>
    %35 = arith.addf %33, %34 : vector<16x16xf32>
    %36 = arith.subf %18, %21 : vector<16x16xf32>
    %37 = arith.subf %19, %22 : vector<16x16xf32>
    %38 = arith.addf %36, %37 : vector<16x16xf32>
    %cst_13 = arith.constant 8.99999984E-4 : f32
    %39 = vector.broadcast %cst_13 : f32 to vector<16x16xf32>
    %40 = arith.addf %38, %39 : vector<16x16xf32>
    %41 = arith.mulf %27, %32 : vector<16x16xf32>
    %42 = arith.mulf %35, %40 : vector<16x16xf32>
    %43 = tpu.reciprocal %42 {approx = true} : vector<16x16xf32> -> vector<16x16xf32>
    %44 = arith.mulf %41, %43 : vector<16x16xf32>
    %c0_14 = arith.constant 0 : index
    %c0_15 = arith.constant 0 : index
    %45 = vector.load %arg5[%c0_14, %c0_15] : memref<16x16xf32, #tpu.memory_space<vmem>>, vector<16x16xf32>
    tpu.vector_store %arg5[%c0_14, %c0_15], %44 {strides = array<i32>} : memref<16x16xf32, #tpu.memory_space<vmem>>, vector<16x16xf32>,
    return
  }
  func.func @transform_0(%arg0: i32) -> (i32, i32) {
    %c0_i32 = arith.constant 0 : i32
    %c0_i32_0 = arith.constant 0 : i32
    return %arg0, %c0_i32 : i32, i32
  }
  func.func @transform_1(%arg0: i32) -> (i32, i32) {
    %c0_i32 = arith.constant 0 : i32
    %c0_i32_0 = arith.constant 0 : i32
    return %arg0, %c0_i32 : i32, i32
  }
  func.func @transform_2(%arg0: i32) -> (i32, i32) {
    %c0_i32 = arith.constant 0 : i32
    %c0_i32_0 = arith.constant 0 : i32
    %c0_i32_1 = arith.constant 0 : i32
    return %c0_i32, %c0_i32_0 : i32, i32
  }
  func.func @transform_3(%arg0: i32) -> (i32, i32) {
    %c0_i32 = arith.constant 0 : i32
    %c0_i32_0 = arith.constant 0 : i32
    %c0_i32_1 = arith.constant 0 : i32
    return %c0_i32, %c0_i32_0 : i32, i32
  }
  func.func @transform_4(%arg0: i32) -> (i32, i32) {
    %c0_i32 = arith.constant 0 : i32
    %c0_i32_0 = arith.constant 0 : i32
    return %arg0, %c0_i32 : i32, i32
  }
}

</mosaic_0001>

<bundles_post_ra>
// kernel: tpu_custom_call.1
= control target key start
LH: loop header
LB: loop body
LE: loop exit
PB: predicated region body
PF: predicated region fallthrough
CT: control target
= control target key end

     0   :  { %s817_s15 = smov 0   ;;  %s878_s0 = inlined_call_operand.vmem [shape: f32[128,16], index: 0, kind: input, shape index: {}]   ;;  %s879_s1 = inlined_call_operand.vmem [shape: f32[128,16], index: 1, kind: input, shape index: {}]   ;;  %s880_s2 = inlined_call_operand.vmem [shape: f32[16,16], index: 2, kind: input, shape index: {}]   ;;  %s881_s3 = inlined_call_operand.vmem [shape: f32[16,16], index: 3, kind: input, shape index: {}]   ;;  %s882_s4 = inlined_call_operand.vmem [shape: f32[128,16], index: 4, kind: output, shape index: {}]  }
   0x1 LB: > { %s663_s16 = sadd.s32 4294967295, %s784_s15   ;;  %p667_p0 = scmp.ge.s32.totalorder %s784_s15, 1  ;;  %s784_s15 = sphi %s817_s15, %s14_s15  }
   0x2   : > { %p174_p1 = scmp.lt.s32.totalorder %s784_s15, 9 }
   0x4   : > { %p175_p2 = pnand %p667_p0, %p174_p1 }
   0x5   : > { %v227_v0 = vld [vmem:[%s880_s2] sm:$0xff] (!%p175_p2)  ;;  %v228_v1 = vld [vmem:[%s880_s2 + $0x8] sm:$0xff] (!%p175_p2)  ;;  %s668_s21 = sshll.u32 (!%p175_p2), %s663_s16, 1  ;;  %vm237_vm0 = vcmask (!%p175_p2), 130048   ;;  %s786_s29 = smov (!%p175_p2), 48   ;;  %vm417_vm1 = vcmask (!%p175_p2), 261120  }
   0x6   : > { %178 = sbr.rel (%p175_p2) target bundleno = 949 (0x3b5), region = 36  ;;  %v730_v2 = vpack.c.bf16 (!%p175_p2), %v228_v1, %v227_v0  ;;  %p206_p3 = scmp.lt.s32.totalorder (!%p175_p2), %s668_s21, 15  ;;  %v229_v22 = vld [vmem:[%s881_s3] sm:$0xff] (!%p175_p2)  ;;  %vm420_vm2 = vcmask (!%p175_p2), 392192   ;;  %vm423_vm3 = vcmask (!%p175_p2), 523264   ;;  %v230_v49 = vld [vmem:[%s881_s3 + $0x8] sm:$0xff] (!%p175_p2) }
   0x7   : > { %s787_s6 = smov (!%p175_p2), 16   ;;  %s788_s7 = smov (!%p175_p2), 64  }
   0x8   : > { %731 = vmatprep.subr.bf16.mxu0 (!%p175_p2), %v730_v2  ;;  %738 = vmatprep.subr.bf16.mxu1 (!%p175_p2), %v730_v2  ;;  %s789_s8 = smov (!%p175_p2), 32   ;;  %s790_s11 = smov (!%p175_p2), 112  }
   0x9   : > { %733 = vmatpush3.bf16.msra.mxu0 (!%p175_p2), %v730_v2  ;;  %739 = vmatpush3.bf16.msra.mxu1 (!%p175_p2), %v730_v2  ;;  %s791_s12 = smov (!%p175_p2), 96  }
   0xd   : > { %s884_s21 = smov (!%p206_p3, %s668_s21), 15 }
   0xe   : > { %s831_s22 = sshll.u32 %s884_s21, 3 }
   0xf   : > { %s209_s25 = scalar_lea.vmem %s878_s0, %s831_s22  ;;  %s215_s28 = scalar_lea.vmem %s879_s1, %s831_s22 }
  0x10   : > { %v223_v3 = vld [vmem:[%s209_s25] sm:$0xff]  ;;  %v224_v4 = vld [vmem:[%s209_s25 + $0x8] sm:$0xff]  ;;  %s221_s16 = scalar_lea.vmem %s882_s4, %s831_s22 }
  0x11   : > { %708 = vmatprep.mubr.msk.f32.mxu0 %vm237_vm0, %v223_v3  ;;  %v225_v5 = vld [vmem:[%s215_s28] sm:$0xff]  ;;  %v226_v6 = vld [vmem:[%s215_s28 + $0x8] sm:$0xff]  ;;  %v231_v10 = vmul.f32 %v223_v3, %v223_v3  ;;  %v232_v12 = vmul.f32 %v224_v4, %v224_v4 }
  0x12   : > { %709 = vmatmul.mubr.msk.f32.vlgmr.msra.gmra.mrb[0].mxu0 %vm237_vm0, %v224_v4  ;;  %v235_v7 = vmul.f32 %v225_v5, %v223_v3  ;;  %v234_v8 = vmul.f32 %v226_v6, %v226_v6  ;;  %v233_v9 = vmul.f32 %v225_v5, %v225_v5  ;;  %v236_v11 = vmul.f32 %v226_v6, %v224_v4 }
  0x13   : > { %711 = vmatprep.mubr.msk.f32.mxu0 %vm237_vm0, %v225_v5 }
  0x14   : > { %717 = vmatprep.mubr.msk.f32.mxu1 %vm237_vm0, %v233_v9 }
  0x15   : > { %718 = vmatmul.mubr.msk.f32.vlgmr.msra.gmra.mrb[0].mxu1 %vm237_vm0, %v234_v8 }
  0x16   : > { %712 = vmatmul.mubr.msk.f32.gmra.mrb[2].mxu0 %vm237_vm0, %v226_v6  ;;  %720 = vmatprep.mubr.msk.f32.mxu1 %vm237_vm0, %v235_v7 }
  0x17   : > { %714 = vmatprep.mubr.msk.f32.mxu0 %vm237_vm0, %v231_v10 }
  0x19   : > { %721 = vmatmul.mubr.msk.f32.gmra.mrb[2].mxu1 %vm237_vm0, %v236_v11 }
  0x1a   : > { %715 = vmatmul.mubr.msk.f32.gmra.mrb[4].mxu0 %vm237_vm0, %v232_v12  ;;  %727 = vmatprep.mubr.msk.f32.mxu1 %vm237_vm0, %v229_v22 }
  0xe5   : > { %v710_v13 = vpop.f32.mrb[0].mxu0 }
  0xe6   : > { %v334_v14 = vpop.f32.mrb[1].mxu0 }
  0xe8   : > { %v719_v15 = vpop.f32.mrb[0].mxu1 }
  0xe9   : > { %v713_v16 = vpop.f32.mrb[2].mxu0  ;;  %v364_v17 = vpop.f32.mrb[1].mxu1 }
  0xea   : > { %v344_v18 = vpop.f32.mrb[3].mxu0  ;;  %v764_v19 = vpack.i.bf16 %v719_v15, %v364_v17 }
  0xeb   : > { %v754_v20 = vpack.i.bf16 %v713_v16, %v344_v18 }
  0xec   : > { %765 = vrot.lane.b32.xlu1 %v764_v19, %s786_s29  ;;  %v722_v21 = vpop.f32.mrb[2].mxu1 }
  0xed   : > { %755 = vrot.lane.b32.xlu0 %v754_v20, %s787_s6  ;;  %v716_v23 = vpop.f32.mrb[4].mxu0  ;;  %v374_v24 = vpop.f32.mrb[3].mxu1 }
  0xee   : > { %v354_v25 = vpop.f32.mrb[5].mxu0  ;;  %v769_v26 = vpack.i.bf16 %v722_v21, %v374_v24 }
  0xef   : > { %v759_v27 = vpack.i.bf16 %v716_v23, %v354_v25 }
  0xf0   : > { %770 = vrot.lane.b32.xlu1 %v769_v26, %s788_s7 }
  0xf1   : > { %760 = vrot.lane.b32.xlu0 %v759_v27, %s789_s8 }
 0x15e   : > { %v766_v28 = vpop.permute.xlu1 %765 }
 0x15f   : > { %v756_v29 = vpop.permute.xlu0 %755  ;;  %v768_v40 = vunpack.i.h.bf16 %v766_v28  ;;  %v767_v41 = vunpack.i.l.bf16 %v766_v28 }
 0x160   : > { %v758_v30 = vunpack.i.h.bf16 %v756_v29  ;;  %v757_v31 = vunpack.i.l.bf16 %v756_v29 }
 0x162   : > { %v771_v32 = vpop.permute.xlu1 %770  ;;  %v416_v38 = vsel %vm237_vm0, %v710_v13, %v758_v30  ;;  %v415_v39 = vsel %vm237_vm0, %v334_v14, %v757_v31 }
 0x163   : > { %v761_v33 = vpop.permute.xlu0 %760  ;;  %v773_v36 = vunpack.i.h.bf16 %v771_v32  ;;  %v772_v37 = vunpack.i.l.bf16 %v771_v32 }
 0x164   : > { %v763_v34 = vunpack.i.h.bf16 %v761_v33  ;;  %v762_v35 = vunpack.i.l.bf16 %v761_v33 }
 0x166   : > { %v419_v42 = vsel %vm417_vm1, %v416_v38, %v763_v34  ;;  %v418_v43 = vsel %vm417_vm1, %v415_v39, %v762_v35 }
 0x167   : > { %v421_v44 = vsel %vm420_vm2, %v418_v43, %v767_v41  ;;  %v422_v45 = vsel %vm420_vm2, %v419_v42, %v768_v40 }
 0x168   : > { %v424_v46 = vsel %vm423_vm3, %v421_v44, %v772_v37  ;;  %v425_v47 = vsel %vm423_vm3, %v422_v45, %v773_v36 }
 0x169   : > { %v734_v48 = vpack.c.bf16 %v425_v47, %v424_v46 }
 0x16b   : > { %735 = vmatprep.subr.bf16.mxu1 %v734_v48 }
 0x16c   : > { %737 = vmatpush3.bf16.msra.mxu1 %v734_v48 }
 0x16f   : > { %728 = vmatmul.mubr.msk.f32.vlgmr.msra.gmra.mrb[4].mxu1 %vm237_vm0, %v230_v49 }
 0x242   : > { %v729_v50 = vpop.f32.mrb[4].mxu1 }
 0x243   : > { %v498_v51 = vpop.f32.mrb[5].mxu1  ;;  %v508_v52 = vmul.f32 %v729_v50, %v729_v50 }
 0x244   : > { %v507_v53 = vmul.f32 %v498_v51, %v498_v51 }
 0x245   : > { %551 = vrot.lane.b32.xlu1 %v508_v52, %s789_s8 }
 0x246   : > { %549 = vrot.lane.b32.xlu0 %v507_v53, %s789_s8 }
 0x249   : > { %513 = vrot.lane.b32.xlu1 %v729_v50, %s790_s11 }
 0x24a   : > { %511 = vrot.lane.b32.xlu0 %v498_v51, %s790_s11 }
 0x2b7   : > { %v552_v54 = vpop.permute.xlu1 %551 }
 0x2b8   : > { %v556_v55 = vsub.f32 %v729_v50, %v552_v54  ;;  %v550_v56 = vpop.permute.xlu0 %549 }
 0x2b9   : > { %v555_v57 = vsub.f32 %v498_v51, %v550_v56 }
 0x2ba   : > { %561 = vrot.lane.b32.xlu1 %v556_v55, %s790_s11 }
 0x2bb   : > { %v514_v58 = vpop.permute.xlu1 %513  ;;  %559 = vrot.lane.b32.xlu0 %v555_v57, %s790_s11 }
 0x2bc   : > { %v518_v59 = vmul.f32 %v729_v50, %v514_v58  ;;  %v512_v60 = vpop.permute.xlu0 %511 }
 0x2bd   : > { %v517_v61 = vmul.f32 %v512_v60, %v498_v51 }
 0x2be   : > { %527 = vrot.lane.b32.xlu1 %v518_v59, %s788_s7  ;;  %v520_v22 = vmul.f32 2.0, %v518_v59 }
 0x2bf   : > { %525 = vrot.lane.b32.xlu0 %v517_v61, %s788_s7  ;;  %v519_v23 = vmul.f32 2.0, %v517_v61 }
 0x2c0   : > { %v522_v25 = vadd.f32 0.0001, %v520_v22 }
 0x2c1   : > { %v521_v27 = vadd.f32 0.0001, %v519_v23 }
 0x2c2   : > { %541 = vrot.lane.b32.xlu1 %v508_v52, %s790_s11 }
 0x2c3   : > { %539 = vrot.lane.b32.xlu0 %v507_v53, %s790_s11 }
 0x32c   : > { %v562_v62 = vpop.permute.xlu1 %561 }
 0x32d   : > { %v566_v63 = vadd.f32 %v562_v62, %v556_v55  ;;  %v560_v0 = vpop.permute.xlu0 %559 }
 0x32e   : > { %v565_v1 = vadd.f32 %v560_v0, %v555_v57 }
 0x32f   : > { %v568_v2 = vadd.f32 0.0009, %v566_v63 }
 0x330   : > { %v567_v3 = vadd.f32 0.0009, %v565_v1  ;;  %v528_v4 = vpop.permute.xlu1 %527 }
 0x331   : > { %v532_v5 = vsub.f32 %v729_v50, %v528_v4  ;;  %583 = vrot.lane.b32.xlu1 %v568_v2, %s791_s12  ;;  %v526_v6 = vpop.permute.xlu0 %525 }
 0x332   : > { %v531_v7 = vsub.f32 %v498_v51, %v526_v6  ;;  %581 = vrot.lane.b32.xlu0 %v567_v3, %s791_s12 }
 0x333   : > { %v534_v8 = vmul.f32 2.0, %v532_v5 }
 0x334   : > { %v533_v9 = vmul.f32 2.0, %v531_v7  ;;  %v542_v12 = vpop.permute.xlu1 %541 }
 0x335   : > { %v536_v10 = vadd.f32 0.0009, %v534_v8  ;;  %v540_v13 = vpop.permute.xlu0 %539  ;;  %v546_v14 = vadd.f32 %v542_v12, %v508_v52 }
 0x336   : > { %v535_v11 = vadd.f32 0.0009, %v533_v9  ;;  %v545_v15 = vadd.f32 %v540_v13, %v507_v53 }
 0x337   : > { %573 = vrot.lane.b32.xlu1 %v536_v10, %s788_s7  ;;  %v548_v16 = vadd.f32 0.0001, %v546_v14 }
 0x338   : > { %571 = vrot.lane.b32.xlu0 %v535_v11, %s788_s7  ;;  %v547_v17 = vadd.f32 0.0001, %v545_v15 }
 0x3a3   : > { %v584_v18 = vpop.permute.xlu1 %583 }
 0x3a4   : > { %v588_v19 = vmul.f32 %v584_v18, %v548_v16  ;;  %v582_v20 = vpop.permute.xlu0 %581 }
 0x3a5   : > { %v587_v21 = vmul.f32 %v582_v20, %v547_v17 }
 0x3a6   : > { %774 = vrcp.f32 %v588_v19 }
 0x3a7   : > { %776 = vrcp.f32 %v587_v21 }
 0x3a9   : > { %v574_v24 = vpop.permute.xlu1 %573 }
 0x3aa   : > { %v572_v26 = vpop.permute.xlu0 %571  ;;  %v578_v28 = vmul.f32 %v574_v24, %v522_v25 }
 0x3ab   : > { %v577_v30 = vmul.f32 %v572_v26, %v521_v27 }
 0x3b0   : > { %v775_v29 = vpop.eup %774 }
 0x3b1   : > { %v777_v31 = vpop.eup %776  ;;  %v592_v32 = vmul.f32 %v775_v29, %v578_v28 }
 0x3b2   : > { %v591_v33 = vmul.f32 %v777_v31, %v577_v30 }
 0x3b3   : > { %594 = vst.msk [vmem:[%s221_s16 + $0x8] sm:$0xff] %vm237_vm0, %v592_v32 }
 0x3b4   : > { %593 = vst.msk [vmem:[%s221_s16] sm:$0xff] %vm237_vm0, %v591_v33 }
 0x3b5 PF: > { %s14_s15 = sadd.s32 1, %s784_s15  }
 0x3b6   : > { %p11_p4 = scmp.ge.s32.totalorder %s14_s15, 10  }
 0x3b8   :  { %13 = sbr.rel (!%p11_p4) target bundleno = 1 (0x1), region = 69 }

</bundles_post_ra>
